<compile_context>
chip_gen: v7x
topology: tpu7x:2x2x1
jax: 0.10.0
libtpu: 0.0.40
codegen_flags: <defaults>
</compile_context>

<pallas_src>
import functools

import jax
import jax.numpy as jnp
from jax import lax
from jax.experimental import pallas as pl
from jax.experimental.pallas import tpu as pltpu


_NEG_LARGE = -1e30  # finite "-inf": padded logits exp to 0 without NaN hazards


def _round_up(x, m):
    return ((x + m - 1) // m) * m


def _choose_tile(dim, preferred, multiple):
    """Largest t <= preferred with t % multiple == 0 and dim % t == 0; else dim."""
    if dim % multiple != 0:
        return dim
    t = max(multiple, min(preferred, dim))
    t = (t // multiple) * multiple
    while t >= multiple and dim % t != 0:
        t -= multiple
    return t if t >= multiple else dim


def _vmem_capacity_bytes():
    try:
        cap = int(pltpu.get_tpu_info().vmem_capacity_bytes)
        if cap > 0:
            return cap
    except Exception:
        pass
    return 64 * 1024 * 1024  # conservative (v7x per-TensorCore physical VMEM)


def _generator_kernel(x_ref, w_ref, b_ref, o_ref, m_run, l_run, m_tile, *,
                      tn, nj, nt_layout, compute_dtype):
    j = pl.program_id(1)

    @pl.when(j == 0)
    def _init():
        m_run[...] = jnp.full_like(m_run, _NEG_LARGE)
        l_run[...] = jnp.zeros_like(l_run)
        m_tile[...] = jnp.full_like(m_tile, _NEG_LARGE)

    # Cast the (small) tiles after DMA; no wrapper-side astype pass over HBM.
    x = x_ref[...].astype(compute_dtype)
    w = w_ref[...].astype(compute_dtype)
    if nt_layout:
        # PyTorch-layout weight tile (tn, K): contract dim 1 of x with dim 1 of w.
        logits = lax.dot_general(
            x, w, dimension_numbers=(((1,), (1,)), ((), ())),
            preferred_element_type=jnp.float32)
    else:
        # Prepared (K, tn) layout: plain NN contraction (no per-tile transpose risk).
        logits = jnp.dot(x, w, preferred_element_type=jnp.float32)
    logits = logits + b_ref[...]                            # (tm, tn) f32

    # Per-tile numerically-stable exponentials; the EUP exp overlaps the next
    # weight-tile DMA, so there is no exposed full-row softmax tail.
    m_j = jnp.max(logits, axis=-1, keepdims=True)           # (tm, 1)
    e_j = jnp.exp(logits - m_j)                              # (tm, tn)
    l_j = jnp.sum(e_j, axis=-1, keepdims=True)               # (tm, 1)

    # Online (flash-style) running max / denominator.
    m_prev = m_run[...]
    m_new = jnp.maximum(m_prev, m_j)
    l_run[...] = l_run[...] * jnp.exp(m_prev - m_new) + l_j * jnp.exp(m_j - m_new)
    m_run[...] = m_new

    # Remember this tile's max for the final rescale.  No dynamic lane indexing:
    # select column j of the (tm, nj) scratch with a broadcast iota mask.
    lane = lax.broadcasted_iota(jnp.int32, m_tile.shape, 1)
    m_tile[...] = jnp.where(lane == j, m_j, m_tile[...])

    if nj == 1:
        o_ref[...] = e_j.astype(o_ref.dtype)
    else:
        # 128-aligned dynamic column slot of the resident (tm, N) output row.
        col = pl.multiple_of(j * tn, tn)
        o_ref[:, pl.ds(col, tn)] = e_j.astype(o_ref.dtype)

    # Finalize: pure VPU rescale of the resident row once all tiles are stored.
    # NOTE: relies on the output BlockSpec returning the same block index across
    # the (innermost, "arbitrary") j axis so the row stays resident in VMEM.
    @pl.when(j == nj - 1)
    def _finalize():
        inv_denom = 1.0 / l_run[...]                              # exact; (tm, 1) only
        scales = jnp.exp(m_tile[...] - m_run[...]) * inv_denom    # (tm, nj)
        for jj in range(nj):                                      # static unroll
            s = scales[:, jj:jj + 1].astype(o_ref.dtype)
            blk = o_ref[:, jj * tn:(jj + 1) * tn]
            o_ref[:, jj * tn:(jj + 1) * tn] = blk * s


def _generator_call(x, w, b2d, *, n_valid, nt_layout, tm, tn, out_dtype):
    batch, input_size = x.shape
    n_pad = w.shape[0] if nt_layout else w.shape[1]
    assert (w.shape[1] if nt_layout else w.shape[0]) == input_size
    assert n_pad % 128 == 0 and b2d.shape == (1, n_pad)

    batch_pad = _round_up(batch, 8)
    if batch_pad != batch:
        x = jnp.pad(x, ((0, batch_pad - batch), (0, 0)))

    x_item = jnp.dtype(x.dtype).itemsize
    w_item = jnp.dtype(w.dtype).itemsize
    out_item = jnp.dtype(out_dtype).itemsize
    compute_dtype = (jnp.bfloat16
                     if (w.dtype == jnp.bfloat16 or x.dtype == jnp.bfloat16)
                     else jnp.float32)

    # ---- generation-aware tile / VMEM budgets ----
    vmem_cap = _vmem_capacity_bytes()            # 128 MiB v5e/v6e, 64 MiB v7x
    limit_cap = int(vmem_cap * 0.85)             # headroom for compiler scratch/sems
    w_budget = int(vmem_cap * 0.30)              # double-buffered weight tile
    o_budget = int(vmem_cap * 0.30)              # resident output row + x tile

    lane_mult = 256 if n_pad % 256 == 0 else 128  # v6e/v7x MXU is 2x256 wide
    if tn is None:
        tn_pref = w_budget // max(1, 2 * input_size * w_item)
        tn_pref = max(lane_mult, (tn_pref // lane_mult) * lane_mult)
        tn = _choose_tile(n_pad, tn_pref, lane_mult)
    if tm is None:
        per_row = 2 * n_pad * out_item + 2 * input_size * x_item
        tm_cap = max(8, (o_budget // max(1, per_row)) // 8 * 8)
        tm = _choose_tile(batch_pad, min(tm_cap, 1024), 8)
        # v7x has 2 TensorCores: keep >= 2 tiles on the "parallel" batch axis.
        if batch_pad // tm < 2 and batch_pad >= 16:
            tm = _choose_tile(batch_pad, batch_pad // 2, 8)
    assert batch_pad % tm == 0 and n_pad % tn == 0
    ni, nj = batch_pad // tm, n_pad // tn

    vmem_est = (
        2 * tm * input_size * x_item            # x tile (double-buffered)
        + 2 * tn * input_size * w_item          # weight tile (double-buffered)
        + 2 * 8 * tn * 4                        # bias tile
        + 2 * tm * n_pad * out_item             # resident output row (+writeback buf)
        + (2 * tm * 128 + tm * max(nj, 128)) * 4  # scratch
    )
    vmem_limit = int(min(limit_cap, max(vmem_est + (4 << 20), 16 << 20)))

    cost = pl.CostEstimate(
        flops=2 * batch_pad * input_size * n_pad,
        transcendentals=batch_pad * n_pad,
        bytes_accessed=(batch_pad * input_size * x_item
                        + ni * n_pad * input_size * w_item   # weight re-streamed per batch tile
                        + n_pad * 4
                        + batch_pad * n_pad * out_item),
    )

    if nt_layout:
        w_spec = pl.BlockSpec((tn, input_size), lambda i, j: (j, 0))
    else:
        w_spec = pl.BlockSpec((input_size, tn), lambda i, j: (0, j))

    kernel = functools.partial(_generator_kernel, tn=tn, nj=nj,
                               nt_layout=nt_layout, compute_dtype=compute_dtype)

    out = pl.pallas_call(
        kernel,
        out_shape=jax.ShapeDtypeStruct((batch_pad, n_pad), out_dtype),
        grid_spec=pltpu.PrefetchScalarGridSpec(
            num_scalar_prefetch=0,
            grid=(ni, nj),
            in_specs=[
                pl.BlockSpec((tm, input_size), lambda i, j: (i, 0)),   # x (fetched once per i)
                w_spec,                                                # weight (streamed, as-given dtype)
                pl.BlockSpec((1, tn), lambda i, j: (0, j)),            # bias tile
            ],
            # Full predict row per batch tile; same block index across j ->
            # stays resident in VMEM, one HBM writeback per batch tile.
            out_specs=pl.BlockSpec((tm, n_pad), lambda i, j: (i, 0)),
            scratch_shapes=[
                pltpu.VMEM((tm, 1), jnp.float32),    # running max
                pltpu.VMEM((tm, 1), jnp.float32),    # running denominator
                pltpu.VMEM((tm, nj), jnp.float32),   # per-tile maxes
            ],
        ),
        compiler_params=pltpu.CompilerParams(
            dimension_semantics=("parallel", "arbitrary"),
            vmem_limit_bytes=vmem_limit,
        ),
        cost_estimate=cost,
    )(x, w, b2d)

    if batch_pad != batch or n_pad != n_valid:
        out = out[:batch, :n_valid]
    return out


def prepare_generator_params(weight, bias, *, dtype=jnp.bfloat16, lane_multiple=128):
    """One-time (cache OUTSIDE the hot path) parameter preparation:
    transpose the PyTorch (predict, input) weight to (input, N_pad), cast to
    `dtype` (bf16 halves weight HBM traffic), pad the vocab to a lane multiple
    (zero weights, -1e30 bias so padded probabilities are exactly 0)."""
    predict_size, input_size = weight.shape
    n_pad = _round_up(predict_size, lane_multiple)
    w_t = jnp.asarray(weight).T.astype(dtype)
    b = jnp.asarray(bias).astype(jnp.float32)
    if n_pad != predict_size:
        w_t = jnp.pad(w_t, ((0, 0), (0, n_pad - predict_size)))
        b = jnp.pad(b, (0, n_pad - predict_size), constant_values=_NEG_LARGE)
    return w_t, b.reshape(1, n_pad), predict_size


def generator_forward(x, weight, bias, *, tm=None, tn=None, out_dtype=jnp.float32):
    """Generator forward: softmax(x @ weight.T + bias, axis=1).

    x:      (batch, input_size)
    weight: PyTorch nn.Linear layout (predict_size, input_size); streamed as-is
            (no per-call cast/transpose).  For repeated calls prefer
            prepare_generator_params() + generator_forward_prepared().
    bias:   (predict_size,)
    """
    batch, input_size = x.shape
    predict_size, k2 = weight.shape
    assert k2 == input_size, "weight must be (predict_size, input_size)"
    n_pad = _round_up(predict_size, 128)
    w = jnp.asarray(weight)
    b = jnp.asarray(bias).astype(jnp.float32)
    if n_pad != predict_size:
        # TODO(synk): for large vocabularies do this padding once at init via
        # prepare_generator_params instead of per call.
        w = jnp.pad(w, ((0, n_pad - predict_size), (0, 0)))
        b = jnp.pad(b, (0, n_pad - predict_size), constant_values=_NEG_LARGE)
    return _generator_call(x, w, b.reshape(1, n_pad), n_valid=predict_size,
                           nt_layout=True, tm=tm, tn=tn, out_dtype=out_dtype)


def generator_forward_prepared(x, w_t, b2d, predict_size, *, tm=None, tn=None,
                               out_dtype=jnp.float32):
    """Hot-path entry: params already transposed/cast/padded by prepare_generator_params."""
    return _generator_call(x, w_t, b2d, n_valid=predict_size, nt_layout=False,
                           tm=tm, tn=tn, out_dtype=out_dtype)


if __name__ == "__main__":
    # Small shapes consistent with the module: x is the decoder's final output
    # vector batch (batch, input_size); output is (batch, predict_size) probs.
    batch = 8
    input_size = 32
    predict_size = 1024

    key = jax.random.PRNGKey(0)
    kx, kw, kb = jax.random.split(key, 3)
    x = jax.random.normal(kx, (batch, input_size), dtype=jnp.float32)
    bound = 1.0 / (input_size ** 0.5)
    weight = jax.random.uniform(kw, (predict_size, input_size),
                                minval=-bound, maxval=bound, dtype=jnp.float32)
    bias = jax.random.uniform(kb, (predict_size,),
                              minval=-bound, maxval=bound, dtype=jnp.float32)

    # A: direct PyTorch-layout f32 weight, auto tiles (single predict tile here).
    out_a = jax.block_until_ready(generator_forward(x, weight, bias))
    # B: forced smaller tn to exercise the multi-tile online-softmax path.
    out_b = jax.block_until_ready(generator_forward(x, weight, bias, tm=8, tn=256))
    # C: cached/prepared bf16 (K, N) weight — the recommended hot-path layout.
    w_prep, b_prep, n_valid = prepare_generator_params(weight, bias)
    out_c = jax.block_until_ready(
        generator_forward_prepared(x, w_prep, b_prep, n_valid, tn=256))

    ref_f32 = jax.nn.softmax(x @ weight.T + bias, axis=1)
    xw_bf16 = (x.astype(jnp.bfloat16).astype(jnp.float32)
               @ weight.astype(jnp.bfloat16).astype(jnp.float32).T) + bias
    ref_bf16 = jax.nn.softmax(xw_bf16, axis=1)

    for name, out, ref, tol in (("f32-direct", out_a, ref_f32, 2e-5),
                                ("f32-tiled", out_b, ref_f32, 2e-5),
                                ("bf16-prepared", out_c, ref_bf16, 1e-3)):
        assert out.shape == (batch, predict_size), (name, out.shape)
        err = float(jnp.max(jnp.abs(out - ref)))
        assert err < tol, (name, err)
        sum_err = float(jnp.max(jnp.abs(jnp.sum(out, axis=1) - 1.0)))
        assert sum_err < 1e-4, (name, sum_err)

    print("KERNEL_OK")
</pallas_src>

<mosaic_0001>
module attributes {stable_mosaic.version = 11 : i64} {
  func.func @_generator_kernel(%arg0: i32, %arg1: i32, %arg2: memref<8x32xf32, #tpu.memory_space<vmem>>, %arg3: memref<1024x32xf32, #tpu.memory_space<vmem>>, %arg4: memref<1x1024xf32, #tpu.memory_space<vmem>>, %arg5: memref<8x1024xf32, #tpu.memory_space<vmem>>, %arg6: memref<8x1xf32, #tpu.memory_space<vmem>>, %arg7: memref<8x1xf32, #tpu.memory_space<vmem>>, %arg8: memref<8x1xf32, #tpu.memory_space<vmem>>) attributes {dimension_semantics = [#tpu.dimension_semantics<parallel>, #tpu.dimension_semantics<arbitrary>], iteration_bounds = array<i64: 1, 1>, scalar_prefetch = 0 : i64, scratch_operands = 3 : i64, tpu.core_type = #tpu.core_type<tc>, window_params = [{transform_indices = @transform_0, window_bounds = array<i64: 8, 32>}, {transform_indices = @transform_1, window_bounds = array<i64: 1024, 32>}, {transform_indices = @transform_2, window_bounds = array<i64: 1, 1024>}, {transform_indices = @transform_3, window_bounds = array<i64: 8, 1024>}]} {
    %c0_i32 = arith.constant 0 : i32
    %0 = arith.cmpi eq, %arg1, %c0_i32 : i32
    %1 = arith.extui %0 : i1 to i32
    %c0_i32_0 = arith.constant 0 : i32
    %2 = arith.cmpi ne, %1, %c0_i32_0 : i32
    scf.if %2 {
      %cst_24 = arith.constant -1.000000e+30 : f32
      %38 = vector.broadcast %cst_24 : f32 to vector<8x1xf32>
      %c0_25 = arith.constant 0 : index
      %c0_26 = arith.constant 0 : index
      %39 = vector.load %arg6[%c0_25, %c0_26] : memref<8x1xf32, #tpu.memory_space<vmem>>, vector<8x1xf32>
      tpu.vector_store %arg6[%c0_25, %c0_26], %38 {strides = array<i32>} : memref<8x1xf32, #tpu.memory_space<vmem>>, vector<8x1xf32>,
      %cst_27 = arith.constant 0.000000e+00 : f32
      %40 = vector.broadcast %cst_27 : f32 to vector<8x1xf32>
      %c0_28 = arith.constant 0 : index
      %c0_29 = arith.constant 0 : index
      %41 = vector.load %arg7[%c0_28, %c0_29] : memref<8x1xf32, #tpu.memory_space<vmem>>, vector<8x1xf32>
      tpu.vector_store %arg7[%c0_28, %c0_29], %40 {strides = array<i32>} : memref<8x1xf32, #tpu.memory_space<vmem>>, vector<8x1xf32>,
      %cst_30 = arith.constant -1.000000e+30 : f32
      %42 = vector.broadcast %cst_30 : f32 to vector<8x1xf32>
      %c0_31 = arith.constant 0 : index
      %c0_32 = arith.constant 0 : index
      %43 = vector.load %arg8[%c0_31, %c0_32] : memref<8x1xf32, #tpu.memory_space<vmem>>, vector<8x1xf32>
      tpu.vector_store %arg8[%c0_31, %c0_32], %42 {strides = array<i32>} : memref<8x1xf32, #tpu.memory_space<vmem>>, vector<8x1xf32>,
    } else {
    }
    %c0 = arith.constant 0 : index
    %c0_1 = arith.constant 0 : index
    %3 = vector.load %arg2[%c0, %c0_1] : memref<8x32xf32, #tpu.memory_space<vmem>>, vector<8x32xf32>
    %c0_2 = arith.constant 0 : index
    %c0_3 = arith.constant 0 : index
    %4 = vector.load %arg3[%c0_2, %c0_3] : memref<1024x32xf32, #tpu.memory_space<vmem>>, vector<1024x32xf32>
    %cst = arith.constant dense<0.000000e+00> : vector<8x1024xf32>
    %5 = tpu.matmul %3, %4, %cst {dimension_numbers = #tpu.dot_dimension_numbers<[1], [1], [0], [0], [0, 0, 1, 0], [], []>} : vector<8x32xf32>, vector<1024x32xf32>, vector<8x1024xf32> -> vector<8x1024xf32>
    %c0_4 = arith.constant 0 : index
    %c0_5 = arith.constant 0 : index
    %6 = vector.load %arg4[%c0_4, %c0_5] : memref<1x1024xf32, #tpu.memory_space<vmem>>, vector<1x1024xf32>
    %7 = vector.broadcast %6 : vector<1x1024xf32> to vector<8x1024xf32>
    %8 = arith.addf %5, %7 : vector<8x1024xf32>
    %cst_6 = arith.constant dense<0xFF800000> : vector<8xf32>
    %9 = vector.multi_reduction <maximumf>, %8, %cst_6 [1] : vector<8x1024xf32> to vector<8xf32>
    %10 = vector.shape_cast %9 : vector<8xf32> to vector<8x1xf32>
    %11 = vector.broadcast %10 : vector<8x1xf32> to vector<8x1024xf32>
    %12 = arith.subf %8, %11 : vector<8x1024xf32>
    %13 = math.exp %12 : vector<8x1024xf32>
    %cst_7 = arith.constant dense<0.000000e+00> : vector<8xf32>
    %14 = vector.multi_reduction <add>, %13, %cst_7 [1] : vector<8x1024xf32> to vector<8xf32>
    %15 = vector.shape_cast %14 : vector<8xf32> to vector<8x1xf32>
    %c0_8 = arith.constant 0 : index
    %c0_9 = arith.constant 0 : index
    %16 = vector.load %arg6[%c0_8, %c0_9] : memref<8x1xf32, #tpu.memory_space<vmem>>, vector<8x1xf32>
    %17 = arith.maximumf %16, %10 : vector<8x1xf32>
    %c0_10 = arith.constant 0 : index
    %c0_11 = arith.constant 0 : index
    %18 = vector.load %arg7[%c0_10, %c0_11] : memref<8x1xf32, #tpu.memory_space<vmem>>, vector<8x1xf32>
    %19 = arith.subf %16, %17 : vector<8x1xf32>
    %20 = math.exp %19 : vector<8x1xf32>
    %21 = arith.mulf %18, %20 : vector<8x1xf32>
    %22 = arith.subf %10, %17 : vector<8x1xf32>
    %23 = math.exp %22 : vector<8x1xf32>
    %24 = arith.mulf %15, %23 : vector<8x1xf32>
    %25 = arith.addf %21, %24 : vector<8x1xf32>
    %c0_12 = arith.constant 0 : index
    %c0_13 = arith.constant 0 : index
    %26 = vector.load %arg7[%c0_12, %c0_13] : memref<8x1xf32, #tpu.memory_space<vmem>>, vector<8x1xf32>
    tpu.vector_store %arg7[%c0_12, %c0_13], %25 {strides = array<i32>} : memref<8x1xf32, #tpu.memory_space<vmem>>, vector<8x1xf32>,
    %c0_14 = arith.constant 0 : index
    %c0_15 = arith.constant 0 : index
    %27 = vector.load %arg6[%c0_14, %c0_15] : memref<8x1xf32, #tpu.memory_space<vmem>>, vector<8x1xf32>
    tpu.vector_store %arg6[%c0_14, %c0_15], %17 {strides = array<i32>} : memref<8x1xf32, #tpu.memory_space<vmem>>, vector<8x1xf32>,
    %28 = tpu.iota {dimensions = array<i32: 1>} : vector<8x1xi32>
    %29 = vector.broadcast %arg1 : i32 to vector<8x1xi32>
    %30 = arith.cmpi eq, %28, %29 : vector<8x1xi32>
    %c0_16 = arith.constant 0 : index
    %c0_17 = arith.constant 0 : index
    %31 = vector.load %arg8[%c0_16, %c0_17] : memref<8x1xf32, #tpu.memory_space<vmem>>, vector<8x1xf32>
    %32 = arith.select %30, %10, %31 : vector<8x1xi1>, vector<8x1xf32>
    %c0_18 = arith.constant 0 : index
    %c0_19 = arith.constant 0 : index
    %33 = vector.load %arg8[%c0_18, %c0_19] : memref<8x1xf32, #tpu.memory_space<vmem>>, vector<8x1xf32>
    tpu.vector_store %arg8[%c0_18, %c0_19], %32 {strides = array<i32>} : memref<8x1xf32, #tpu.memory_space<vmem>>, vector<8x1xf32>,
    %c0_20 = arith.constant 0 : index
    %c0_21 = arith.constant 0 : index
    %34 = vector.load %arg5[%c0_20, %c0_21] : memref<8x1024xf32, #tpu.memory_space<vmem>>, vector<8x1024xf32>
    tpu.vector_store %arg5[%c0_20, %c0_21], %13 {strides = array<i32>} : memref<8x1024xf32, #tpu.memory_space<vmem>>, vector<8x1024xf32>,
    %c0_i32_22 = arith.constant 0 : i32
    %35 = arith.cmpi eq, %arg1, %c0_i32_22 : i32
    %36 = arith.extui %35 : i1 to i32
    %c0_i32_23 = arith.constant 0 : i32
    %37 = arith.cmpi ne, %36, %c0_i32_23 : i32
    scf.if %37 {
      %c0_24 = arith.constant 0 : index
      %c0_25 = arith.constant 0 : index
      %38 = vector.load %arg7[%c0_24, %c0_25] : memref<8x1xf32, #tpu.memory_space<vmem>>, vector<8x1xf32>
      %cst_26 = arith.constant 1.000000e+00 : f32
      %39 = vector.broadcast %cst_26 : f32 to vector<8x1xf32>
      %40 = arith.divf %39, %38 : vector<8x1xf32>
      %c0_27 = arith.constant 0 : index
      %c0_28 = arith.constant 0 : index
      %41 = vector.load %arg8[%c0_27, %c0_28] : memref<8x1xf32, #tpu.memory_space<vmem>>, vector<8x1xf32>
      %c0_29 = arith.constant 0 : index
      %c0_30 = arith.constant 0 : index
      %42 = vector.load %arg6[%c0_29, %c0_30] : memref<8x1xf32, #tpu.memory_space<vmem>>, vector<8x1xf32>
      %43 = arith.subf %41, %42 : vector<8x1xf32>
      %44 = math.exp %43 : vector<8x1xf32>
      %45 = arith.mulf %44, %40 : vector<8x1xf32>
      %c0_31 = arith.constant 0 : index
      %c0_32 = arith.constant 0 : index
      %46 = vector.load %arg5[%c0_31, %c0_32] : memref<8x1024xf32, #tpu.memory_space<vmem>>, vector<8x1024xf32>
      %47 = vector.broadcast %45 : vector<8x1xf32> to vector<8x1024xf32>
      %48 = arith.mulf %46, %47 : vector<8x1024xf32>
      %c0_33 = arith.constant 0 : index
      %c0_34 = arith.constant 0 : index
      %49 = vector.load %arg5[%c0_33, %c0_34] : memref<8x1024xf32, #tpu.memory_space<vmem>>, vector<8x1024xf32>
      tpu.vector_store %arg5[%c0_33, %c0_34], %48 {strides = array<i32>} : memref<8x1024xf32, #tpu.memory_space<vmem>>, vector<8x1024xf32>,
    } else {
    }
    return
  }
  func.func @transform_0(%arg0: i32, %arg1: i32) -> (i32, i32) {
    %c0_i32 = arith.constant 0 : i32
    %c0_i32_0 = arith.constant 0 : i32
    return %arg0, %c0_i32 : i32, i32
  }
  func.func @transform_1(%arg0: i32, %arg1: i32) -> (i32, i32) {
    %c0_i32 = arith.constant 0 : i32
    %c0_i32_0 = arith.constant 0 : i32
    return %arg1, %c0_i32 : i32, i32
  }
  func.func @transform_2(%arg0: i32, %arg1: i32) -> (i32, i32) {
    %c0_i32 = arith.constant 0 : i32
    %c0_i32_0 = arith.constant 0 : i32
    return %c0_i32, %arg1 : i32, i32
  }
  func.func @transform_3(%arg0: i32, %arg1: i32) -> (i32, i32) {
    %c0_i32 = arith.constant 0 : i32
    %c0_i32_0 = arith.constant 0 : i32
    return %arg0, %c0_i32 : i32, i32
  }
}

</mosaic_0001>

<bundles_post_ra>
// kernel: tpu_custom_call.1
= control target key start
LH: loop header
LB: loop body
LE: loop exit
PB: predicated region body
PF: predicated region fallthrough
CT: control target
= control target key end

     0   :  { %vm194_vm0 = vcmask 261120   ;;  %s2091_s0 = inlined_call_operand.vmem [shape: f32[8,32], index: 0, kind: input, shape index: {}]   ;;  %s2092_s1 = inlined_call_operand.vmem [shape: f32[1024,32], index: 1, kind: input, shape index: {}]   ;;  %s2093_s2 = inlined_call_operand.vmem [shape: f32[1,1024], index: 2, kind: input, shape index: {}]   ;;  %s2094_s3 = inlined_call_operand.hbm [shape: f32[8,1024], index: 3, kind: output, shape index: {}]  }
   0x1   :  { %v40_v0 = vld [vmem:[%s2092_s1 + $0x80] sm:$0xff]  ;;  %v41_v1 = vld [vmem:[%s2092_s1 + $0x88] sm:$0xff]  ;;  %vm1542_vm1 = vmpackc.low %vm194_vm0, %vm194_vm0 }
   0x2   :  { %v72_v2 = vld [vmem:[%s2092_s1 + $0x180] sm:$0xff]  ;;  %v1261_v3 = vpack.c.bf16 %v41_v1, %v40_v0  ;;  %v73_v5 = vld [vmem:[%s2092_s1 + $0x188] sm:$0xff]  ;;  %v42_v13 = vld [vmem:[%s2092_s1 + $0x90] sm:$0xff] }
   0x3   :  { %v24_v6 = vld [vmem:[%s2092_s1] sm:$0xff]  ;;  %v1309_v7 = vpack.c.bf16 %v73_v5, %v72_v2  ;;  %v25_v8 = vld [vmem:[%s2092_s1 + $0x8] sm:$0xff]  ;;  %v43_v14 = vld [vmem:[%s2092_s1 + $0x98] sm:$0xff] }
   0x4   :  { %v56_v9 = vld [vmem:[%s2092_s1 + $0x100] sm:$0xff]  ;;  %v57_v10 = vld [vmem:[%s2092_s1 + $0x108] sm:$0xff]  ;;  %1263 = vmatprep.subr.msk.bf16.mxu0 %vm1542_vm1, %v1261_v3  ;;  %v1264_v11 = vpack.c.bf16 %v25_v8, %v24_v6  ;;  %v74_v15 = vld [vmem:[%s2092_s1 + $0x190] sm:$0xff]  ;;  %v1267_v16 = vpack.c.bf16 %v43_v14, %v42_v13 }
   0x5   :  { %v1312_v12 = vpack.c.bf16 %v57_v10, %v56_v9  ;;  %1311 = vmatprep.subr.msk.bf16.mxu1 %vm1542_vm1, %v1309_v7  ;;  %v75_v17 = vld [vmem:[%s2092_s1 + $0x198] sm:$0xff]  ;;  %v26_v19 = vld [vmem:[%s2092_s1 + $0x10] sm:$0xff]  ;;  %v44_v23 = vld [vmem:[%s2092_s1 + $0xa0] sm:$0xff] }
   0x6   :  { %1266 = vmatpush3.bf16.xpose.msk.msra.mxu0 %vm1542_vm1, %v1264_v11  ;;  %v1315_v18 = vpack.c.bf16 %v75_v17, %v74_v15  ;;  %v27_v20 = vld [vmem:[%s2092_s1 + $0x18] sm:$0xff]  ;;  %v58_v21 = vld [vmem:[%s2092_s1 + $0x110] sm:$0xff]  ;;  %v45_v24 = vld [vmem:[%s2092_s1 + $0xa8] sm:$0xff] }
   0x7   :  { %1314 = vmatpush3.bf16.xpose.msk.msra.mxu1 %vm1542_vm1, %v1312_v12  ;;  %1269 = vmatprep.subr.msk.bf16.mxu0 %vm1542_vm1, %v1267_v16  ;;  %v59_v22 = vld [vmem:[%s2092_s1 + $0x118] sm:$0xff]  ;;  %v76_v25 = vld [vmem:[%s2092_s1 + $0x1a0] sm:$0xff]  ;;  %v77_v26 = vld [vmem:[%s2092_s1 + $0x1a8] sm:$0xff]  ;;  %v1270_v27 = vpack.c.bf16 %v27_v20, %v26_v19  ;;  %v1273_v29 = vpack.c.bf16 %v45_v24, %v44_v23 }
   0x8   :  { %1317 = vmatprep.subr.msk.bf16.mxu1 %vm1542_vm1, %v1315_v18  ;;  %v1318_v28 = vpack.c.bf16 %v59_v22, %v58_v21  ;;  %v1321_v30 = vpack.c.bf16 %v77_v26, %v76_v25  ;;  %v28_v31 = vld [vmem:[%s2092_s1 + $0x20] sm:$0xff]  ;;  %v29_v32 = vld [vmem:[%s2092_s1 + $0x28] sm:$0xff]  ;;  %v46_v35 = vld [vmem:[%s2092_s1 + $0xb0] sm:$0xff] }
   0x9   :  { %v60_v33 = vld [vmem:[%s2092_s1 + $0x120] sm:$0xff]  ;;  %v61_v34 = vld [vmem:[%s2092_s1 + $0x128] sm:$0xff]  ;;  %v47_v36 = vld [vmem:[%s2092_s1 + $0xb8] sm:$0xff]  ;;  %v1276_v39 = vpack.c.bf16 %v29_v32, %v28_v31 }
   0xa   :  { %v78_v37 = vld [vmem:[%s2092_s1 + $0x1b0] sm:$0xff]  ;;  %v79_v38 = vld [vmem:[%s2092_s1 + $0x1b8] sm:$0xff]  ;;  %v1324_v40 = vpack.c.bf16 %v61_v34, %v60_v33  ;;  %v1279_v41 = vpack.c.bf16 %v47_v36, %v46_v35  ;;  %v1654_v45 = vld [vmem:[%s2091_s0] sm:$0xff] }
   0xb   :  { %v1327_v42 = vpack.c.bf16 %v79_v38, %v78_v37  ;;  %v30_v43 = vld [vmem:[%s2092_s1 + $0x30] sm:$0xff]  ;;  %v31_v44 = vld [vmem:[%s2092_s1 + $0x38] sm:$0xff]  ;;  %v48_v48 = vld [vmem:[%s2092_s1 + $0xc0] sm:$0xff]  ;;  %1157 = vmatprep.mubr.msk.f32.mxu0 %vm194_vm0, %v1654_v45  ;;  %1191 = vmatprep.mubr.msk.f32.mxu1 %vm194_vm0, %v1654_v45 }
   0xc   :  { %v62_v46 = vld [vmem:[%s2092_s1 + $0x130] sm:$0xff]  ;;  %v63_v47 = vld [vmem:[%s2092_s1 + $0x138] sm:$0xff]  ;;  %v49_v49 = vld [vmem:[%s2092_s1 + $0xc8] sm:$0xff]  ;;  %v1282_v52 = vpack.c.bf16 %v31_v44, %v30_v43 }
   0xd   :  { %v80_v50 = vld [vmem:[%s2092_s1 + $0x1c0] sm:$0xff]  ;;  %v81_v51 = vld [vmem:[%s2092_s1 + $0x1c8] sm:$0xff]  ;;  %v1330_v53 = vpack.c.bf16 %v63_v47, %v62_v46  ;;  %v1285_v54 = vpack.c.bf16 %v49_v49, %v48_v48  ;;  %v50_v60 = vld [vmem:[%s2092_s1 + $0xd0] sm:$0xff] }
   0xe   :  { %1272 = vmatpush3.bf16.xpose.msk.msra.mxu0 %vm1542_vm1, %v1270_v27  ;;  %v1333_v55 = vpack.c.bf16 %v81_v51, %v80_v50  ;;  %v32_v56 = vld [vmem:[%s2092_s1 + $0x40] sm:$0xff]  ;;  %v33_v57 = vld [vmem:[%s2092_s1 + $0x48] sm:$0xff]  ;;  %v51_v61 = vld [vmem:[%s2092_s1 + $0xd8] sm:$0xff] }
   0xf   :  { %1320 = vmatpush3.bf16.xpose.msk.msra.mxu1 %vm1542_vm1, %v1318_v28  ;;  %1275 = vmatprep.subr.msk.bf16.mxu0 %vm1542_vm1, %v1273_v29  ;;  %v64_v58 = vld [vmem:[%s2092_s1 + $0x140] sm:$0xff]  ;;  %v65_v59 = vld [vmem:[%s2092_s1 + $0x148] sm:$0xff]  ;;  %v82_v62 = vld [vmem:[%s2092_s1 + $0x1d0] sm:$0xff]  ;;  %v1288_v0 = vpack.c.bf16 %v33_v57, %v32_v56  ;;  %v1291_v2 = vpack.c.bf16 %v51_v61, %v50_v60 }
  0x10   :  { %1323 = vmatprep.subr.msk.bf16.mxu1 %vm1542_vm1, %v1321_v30  ;;  %v83_v63 = vld [vmem:[%s2092_s1 + $0x1d8] sm:$0xff]  ;;  %v1336_v1 = vpack.c.bf16 %v65_v59, %v64_v58  ;;  %v34_v5 = vld [vmem:[%s2092_s1 + $0x50] sm:$0xff]  ;;  %v52_v9 = vld [vmem:[%s2092_s1 + $0xe0] sm:$0xff] }
  0x11   :  { %v1339_v3 = vpack.c.bf16 %v83_v63, %v82_v62  ;;  %v35_v6 = vld [vmem:[%s2092_s1 + $0x58] sm:$0xff]  ;;  %v66_v7 = vld [vmem:[%s2092_s1 + $0x150] sm:$0xff]  ;;  %v53_v10 = vld [vmem:[%s2092_s1 + $0xe8] sm:$0xff] }
  0x12   :  { %v67_v8 = vld [vmem:[%s2092_s1 + $0x158] sm:$0xff]  ;;  %v84_v11 = vld [vmem:[%s2092_s1 + $0x1e0] sm:$0xff]  ;;  %v85_v12 = vld [vmem:[%s2092_s1 + $0x1e8] sm:$0xff]  ;;  %v1294_v13 = vpack.c.bf16 %v35_v6, %v34_v5  ;;  %v1297_v15 = vpack.c.bf16 %v53_v10, %v52_v9 }
  0x13   :  { %v1342_v14 = vpack.c.bf16 %v67_v8, %v66_v7  ;;  %v1345_v16 = vpack.c.bf16 %v85_v12, %v84_v11 }
  0x16   :  { %1278 = vmatpush3.bf16.xpose.msk.msra.mxu0 %vm1542_vm1, %v1276_v39 }
  0x17   :  { %1326 = vmatpush3.bf16.xpose.msk.msra.mxu1 %vm1542_vm1, %v1324_v40  ;;  %1281 = vmatprep.subr.msk.bf16.mxu0 %vm1542_vm1, %v1279_v41 }
  0x18   :  { %1329 = vmatprep.subr.msk.bf16.mxu1 %vm1542_vm1, %v1327_v42 }
  0x1e   :  { %1284 = vmatpush3.bf16.xpose.msk.msra.mxu0 %vm1542_vm1, %v1282_v52 }
  0x1f   :  { %1332 = vmatpush3.bf16.xpose.msk.msra.mxu1 %vm1542_vm1, %v1330_v53  ;;  %1287 = vmatprep.subr.msk.bf16.mxu0 %vm1542_vm1, %v1285_v54 }
  0x20   :  { %1335 = vmatprep.subr.msk.bf16.mxu1 %vm1542_vm1, %v1333_v55 }
  0x26   :  { %1290 = vmatpush3.bf16.xpose.msk.msra.mxu0 %vm1542_vm1, %v1288_v0 }
  0x27   :  { %1338 = vmatpush3.bf16.xpose.msk.msra.mxu1 %vm1542_vm1, %v1336_v1  ;;  %1293 = vmatprep.subr.msk.bf16.mxu0 %vm1542_vm1, %v1291_v2 }
  0x28   :  { %1341 = vmatprep.subr.msk.bf16.mxu1 %vm1542_vm1, %v1339_v3 }
  0x29   :  { %8 = vsyncpa [#allocation6], 0  ;;  %v36_v17 = vld [vmem:[%s2092_s1 + $0x60] sm:$0xff]  ;;  %v37_v18 = vld [vmem:[%s2092_s1 + $0x68] sm:$0xff]  ;;  %vm19_vm2 = vcmask 7168  }
  0x2a   :  { %v68_v19 = vld [vmem:[%s2092_s1 + $0x160] sm:$0xff]  ;;  %v69_v20 = vld [vmem:[%s2092_s1 + $0x168] sm:$0xff]  ;;  %v54_v21 = vld [vmem:[%s2092_s1 + $0xf0] sm:$0xff]  ;;  %v1300_v25 = vpack.c.bf16 %v37_v18, %v36_v17 }
  0x2b   :  { %v55_v22 = vld [vmem:[%s2092_s1 + $0xf8] sm:$0xff]  ;;  %v86_v23 = vld [vmem:[%s2092_s1 + $0x1f0] sm:$0xff]  ;;  %v1348_v26 = vpack.c.bf16 %v69_v20, %v68_v19  ;;  %v104_v33 = vld [vmem:[%s2092_s1 + $0x280] sm:$0xff] }
  0x2c   :  { %v87_v24 = vld [vmem:[%s2092_s1 + $0x1f8] sm:$0xff]  ;;  %v1303_v27 = vpack.c.bf16 %v55_v22, %v54_v21  ;;  %v38_v29 = vld [vmem:[%s2092_s1 + $0x70] sm:$0xff]  ;;  %v105_v34 = vld [vmem:[%s2092_s1 + $0x288] sm:$0xff] }
  0x2d   :  { %v1351_v28 = vpack.c.bf16 %v87_v24, %v86_v23  ;;  %v39_v30 = vld [vmem:[%s2092_s1 + $0x78] sm:$0xff]  ;;  %v70_v31 = vld [vmem:[%s2092_s1 + $0x170] sm:$0xff]  ;;  %v136_v35 = vld [vmem:[%s2092_s1 + $0x380] sm:$0xff]  ;;  %v1357_v39 = vpack.c.bf16 %v105_v34, %v104_v33 }
  0x2e   :  { %1296 = vmatpush3.bf16.xpose.msk.msra.mxu0 %vm1542_vm1, %v1294_v13  ;;  %v71_v32 = vld [vmem:[%s2092_s1 + $0x178] sm:$0xff]  ;;  %v137_v36 = vld [vmem:[%s2092_s1 + $0x388] sm:$0xff]  ;;  %v1306_v37 = vpack.c.bf16 %v39_v30, %v38_v29  ;;  %v88_v41 = vld [vmem:[%s2092_s1 + $0x200] sm:$0xff] }
  0x2f   :  { %1344 = vmatpush3.bf16.xpose.msk.msra.mxu1 %vm1542_vm1, %v1342_v14  ;;  %1299 = vmatprep.subr.msk.bf16.mxu0 %vm1542_vm1, %v1297_v15  ;;  %v1354_v38 = vpack.c.bf16 %v71_v32, %v70_v31  ;;  %v1405_v40 = vpack.c.bf16 %v137_v36, %v136_v35  ;;  %v89_v42 = vld [vmem:[%s2092_s1 + $0x208] sm:$0xff]  ;;  %v120_v43 = vld [vmem:[%s2092_s1 + $0x300] sm:$0xff]  ;;  %v106_v46 = vld [vmem:[%s2092_s1 + $0x290] sm:$0xff] }
  0x30   :  { %1347 = vmatprep.subr.msk.bf16.mxu1 %vm1542_vm1, %v1345_v16  ;;  %v121_v44 = vld [vmem:[%s2092_s1 + $0x308] sm:$0xff]  ;;  %v107_v47 = vld [vmem:[%s2092_s1 + $0x298] sm:$0xff]  ;;  %v138_v48 = vld [vmem:[%s2092_s1 + $0x390] sm:$0xff]  ;;  %v1360_v50 = vpack.c.bf16 %v89_v42, %v88_v41 }
  0x31   :  { %v139_v49 = vld [vmem:[%s2092_s1 + $0x398] sm:$0xff]  ;;  %v1408_v51 = vpack.c.bf16 %v121_v44, %v120_v43  ;;  %v1363_v52 = vpack.c.bf16 %v107_v47, %v106_v46  ;;  %v90_v54 = vld [vmem:[%s2092_s1 + $0x210] sm:$0xff]  ;;  %v108_v58 = vld [vmem:[%s2092_s1 + $0x2a0] sm:$0xff] }
  0x32   :  { %v1411_v53 = vpack.c.bf16 %v139_v49, %v138_v48  ;;  %v91_v55 = vld [vmem:[%s2092_s1 + $0x218] sm:$0xff]  ;;  %v122_v56 = vld [vmem:[%s2092_s1 + $0x310] sm:$0xff]  ;;  %v109_v59 = vld [vmem:[%s2092_s1 + $0x2a8] sm:$0xff] }
  0x33   :  { %v123_v57 = vld [vmem:[%s2092_s1 + $0x318] sm:$0xff]  ;;  %v140_v60 = vld [vmem:[%s2092_s1 + $0x3a0] sm:$0xff]  ;;  %v141_v61 = vld [vmem:[%s2092_s1 + $0x3a8] sm:$0xff]  ;;  %v1366_v62 = vpack.c.bf16 %v91_v55, %v90_v54  ;;  %v1369_v0 = vpack.c.bf16 %v109_v59, %v108_v58 }
  0x34   :  { %v1414_v63 = vpack.c.bf16 %v123_v57, %v122_v56  ;;  %v1417_v1 = vpack.c.bf16 %v141_v61, %v140_v60  ;;  %v92_v2 = vld [vmem:[%s2092_s1 + $0x220] sm:$0xff]  ;;  %v93_v3 = vld [vmem:[%s2092_s1 + $0x228] sm:$0xff]  ;;  %v110_v7 = vld [vmem:[%s2092_s1 + $0x2b0] sm:$0xff] }
  0x35   :  { %v124_v5 = vld [vmem:[%s2092_s1 + $0x320] sm:$0xff]  ;;  %v125_v6 = vld [vmem:[%s2092_s1 + $0x328] sm:$0xff]  ;;  %v111_v8 = vld [vmem:[%s2092_s1 + $0x2b8] sm:$0xff]  ;;  %v1372_v11 = vpack.c.bf16 %v93_v3, %v92_v2 }
  0x36   :  { %1302 = vmatpush3.bf16.xpose.msk.msra.mxu0 %vm1542_vm1, %v1300_v25  ;;  %v142_v9 = vld [vmem:[%s2092_s1 + $0x3b0] sm:$0xff]  ;;  %v143_v10 = vld [vmem:[%s2092_s1 + $0x3b8] sm:$0xff]  ;;  %v1420_v12 = vpack.c.bf16 %v125_v6, %v124_v5  ;;  %v1375_v13 = vpack.c.bf16 %v111_v8, %v110_v7  ;;  %v112_v19 = vld [vmem:[%s2092_s1 + $0x2c0] sm:$0xff] }
  0x37   :  { %1350 = vmatpush3.bf16.xpose.msk.msra.mxu1 %vm1542_vm1, %v1348_v26  ;;  %1305 = vmatprep.subr.msk.bf16.mxu0 %vm1542_vm1, %v1303_v27  ;;  %v1423_v14 = vpack.c.bf16 %v143_v10, %v142_v9  ;;  %v94_v15 = vld [vmem:[%s2092_s1 + $0x230] sm:$0xff]  ;;  %v95_v16 = vld [vmem:[%s2092_s1 + $0x238] sm:$0xff]  ;;  %v113_v20 = vld [vmem:[%s2092_s1 + $0x2c8] sm:$0xff] }
  0x38   :  { %1353 = vmatprep.subr.msk.bf16.mxu1 %vm1542_vm1, %v1351_v28  ;;  %v126_v17 = vld [vmem:[%s2092_s1 + $0x330] sm:$0xff]  ;;  %v127_v18 = vld [vmem:[%s2092_s1 + $0x338] sm:$0xff]  ;;  %v144_v21 = vld [vmem:[%s2092_s1 + $0x3c0] sm:$0xff]  ;;  %v1378_v23 = vpack.c.bf16 %v95_v16, %v94_v15  ;;  %v1381_v25 = vpack.c.bf16 %v113_v20, %v112_v19 }
  0x39   :  { %v145_v22 = vld [vmem:[%s2092_s1 + $0x3c8] sm:$0xff]  ;;  %v1426_v24 = vpack.c.bf16 %v127_v18, %v126_v17  ;;  %v96_v27 = vld [vmem:[%s2092_s1 + $0x240] sm:$0xff]  ;;  %v114_v31 = vld [vmem:[%s2092_s1 + $0x2d0] sm:$0xff] }
  0x3a   :  { %v1429_v26 = vpack.c.bf16 %v145_v22, %v144_v21  ;;  %v97_v28 = vld [vmem:[%s2092_s1 + $0x248] sm:$0xff]  ;;  %v128_v29 = vld [vmem:[%s2092_s1 + $0x340] sm:$0xff]  ;;  %v115_v32 = vld [vmem:[%s2092_s1 + $0x2d8] sm:$0xff] }
  0x3b   :  { %v129_v30 = vld [vmem:[%s2092_s1 + $0x348] sm:$0xff]  ;;  %v146_v33 = vld [vmem:[%s2092_s1 + $0x3d0] sm:$0xff]  ;;  %v147_v34 = vld [vmem:[%s2092_s1 + $0x3d8] sm:$0xff]  ;;  %v1384_v35 = vpack.c.bf16 %v97_v28, %v96_v27 }
  0x3c   :  { %v1432_v36 = vpack.c.bf16 %v129_v30, %v128_v29  ;;  %v130_v41 = vld [vmem:[%s2092_s1 + $0x350] sm:$0xff]  ;;  %v131_v42 = vld [vmem:[%s2092_s1 + $0x358] sm:$0xff]  ;;  %v116_v43 = vld [vmem:[%s2092_s1 + $0x2e0] sm:$0xff] }
  0x3d   :  { %v117_v44 = vld [vmem:[%s2092_s1 + $0x2e8] sm:$0xff]  ;;  %v148_v46 = vld [vmem:[%s2092_s1 + $0x3e0] sm:$0xff]  ;;  %v1438_v49 = vpack.c.bf16 %v131_v42, %v130_v41  ;;  %v118_v56 = vld [vmem:[%s2092_s1 + $0x2f0] sm:$0xff] }
  0x3e   :  { %1308 = vmatpush3.bf16.xpose.msk.msra.mxu0 %vm1542_vm1, %v1306_v37  ;;  %v1387_v37 = vpack.c.bf16 %v115_v32, %v114_v31  ;;  %v149_v47 = vld [vmem:[%s2092_s1 + $0x3e8] sm:$0xff]  ;;  %v132_v54 = vld [vmem:[%s2092_s1 + $0x360] sm:$0xff]  ;;  %v119_v57 = vld [vmem:[%s2092_s1 + $0x2f8] sm:$0xff] }
  0x3f   :  { %1356 = vmatpush3.bf16.xpose.msk.msra.mxu1 %vm1542_vm1, %v1354_v38  ;;  %1359 = vmatprep.subr.msk.bf16.mxu0 %vm1542_vm1, %v1357_v39  ;;  %v1435_v38 = vpack.c.bf16 %v147_v34, %v146_v33  ;;  %v98_v39 = vld [vmem:[%s2092_s1 + $0x250] sm:$0xff]  ;;  %v133_v55 = vld [vmem:[%s2092_s1 + $0x368] sm:$0xff]  ;;  %v151_v59 = vld [vmem:[%s2092_s1 + $0x3f8] sm:$0xff] }
  0x40   :  { %1407 = vmatprep.subr.msk.bf16.mxu1 %vm1542_vm1, %v1405_v40  ;;  %v99_v40 = vld [vmem:[%s2092_s1 + $0x258] sm:$0xff]  ;;  %v150_v58 = vld [vmem:[%s2092_s1 + $0x3f0] sm:$0xff]  ;;  %v1444_v61 = vpack.c.bf16 %v133_v55, %v132_v54  ;;  %v152_v4 = vld [vmem:[%s2093_s2] sm:$0xff]  ;;  %s1510_s2 = smov [#allocation5]  }
  0x41   :  { %v1390_v48 = vpack.c.bf16 %v99_v40, %v98_v39  ;;  %v134_v2 = vld [vmem:[%s2092_s1 + $0x370] sm:$0xff]  ;;  %v135_v3 = vld [vmem:[%s2092_s1 + $0x378] sm:$0xff]  ;;  %s985_s21 = sshll.u32 %s1510_s2, 4  ;;  %s986_s21 = int_to_ptr.vmem [resolvable:$true] %s985_s21 }
  0x42   :  { %v1450_v6 = vpack.c.bf16 %v135_v3, %v134_v2  ;;  %s1483_s22 = scalar_lea.vmem %s986_s21, 1024  ;;  %p1488_p1 = scmp.lt.s32.totalorder %s986_s21, %s986_s21 }
  0x43   :  { %p1484_p0 = scmp.ne.s32.totalorder %s986_s21, %s1483_s22  ;;  %p1489_p2 = scmp.lt.s32.totalorder %s1483_s22, %s1483_s22 }
  0x45   :  { %1158 = vmatmul.mubr.msk.f32.vlgmr.msra.gmra.mrb[0].mxu0 %vm194_vm0, %v1654_v45  ;;  %p1490_p3 = por %p1489_p2, %p1488_p1 }
  0x46   :  { %1192 = vmatmul.mubr.msk.f32.vlgmr.msra.gmra.mrb[0].mxu1 %vm194_vm0, %v1654_v45  ;;  %1362 = vmatpush3.bf16.xpose.msk.msra.mxu0 %vm1542_vm1, %v1360_v50  ;;  %v1393_v50 = vpack.c.bf16 %v117_v44, %v116_v43 }
  0x47   :  { %1410 = vmatpush3.bf16.xpose.msk.msra.mxu1 %vm1542_vm1, %v1408_v51  ;;  %1365 = vmatprep.subr.msk.bf16.mxu0 %vm1542_vm1, %v1363_v52  ;;  %v1441_v51 = vpack.c.bf16 %v149_v47, %v148_v46  ;;  %v100_v52 = vld [vmem:[%s2092_s1 + $0x260] sm:$0xff]  ;;  %p1491_p4 = pnand %p1490_p3, %p1484_p0 }
  0x48   :  { %1413 = vmatprep.subr.msk.bf16.mxu1 %vm1542_vm1, %v1411_v53  ;;  %1225 = vmatprep.mubr.msk.f32.mxu0 %vm194_vm0, %v1654_v45  ;;  %v101_v53 = vld [vmem:[%s2092_s1 + $0x268] sm:$0xff] }
  0x49   :  { %1259 = vmatprep.mubr.msk.f32.mxu1 %vm194_vm0, %v1654_v45  ;;  %v1396_v60 = vpack.c.bf16 %v101_v53, %v100_v52 }
  0x4e   :  { %1368 = vmatpush3.bf16.xpose.msk.msra.mxu0 %vm1542_vm1, %v1366_v62  ;;  %v1399_v62 = vpack.c.bf16 %v119_v57, %v118_v56 }
  0x4f   :  { %1416 = vmatpush3.bf16.xpose.msk.msra.mxu1 %vm1542_vm1, %v1414_v63  ;;  %1371 = vmatprep.subr.msk.bf16.mxu0 %vm1542_vm1, %v1369_v0  ;;  %v1447_v63 = vpack.c.bf16 %v151_v59, %v150_v58  ;;  %v102_v0 = vld [vmem:[%s2092_s1 + $0x270] sm:$0xff] }
  0x50   :  { %1419 = vmatprep.subr.msk.bf16.mxu1 %vm1542_vm1, %v1417_v1  ;;  %v103_v1 = vld [vmem:[%s2092_s1 + $0x278] sm:$0xff] }
  0x51   :  { %v1402_v5 = vpack.c.bf16 %v103_v1, %v102_v0 }
  0x56   :  { %1374 = vmatpush3.bf16.xpose.msk.msra.mxu0 %vm1542_vm1, %v1372_v11  ;;  %v154_v11 = vlaneseq }
  0x57   :  { %1422 = vmatpush3.bf16.xpose.msk.msra.mxu1 %vm1542_vm1, %v1420_v12  ;;  %1377 = vmatprep.subr.msk.bf16.mxu0 %vm1542_vm1, %v1375_v13 }
  0x58   :  { %1425 = vmatprep.subr.msk.bf16.mxu1 %vm1542_vm1, %v1423_v14  ;;  %v155_v12 = vshrl.u32 %v154_v11, 7 }
  0x5a   :  { %v156_v13 = vsub.s32 0, %v155_v12  ;;  %v164_v14 = vsub.s32 2, %v155_v12  ;;  %v172_v15 = vsub.s32 4, %v155_v12  ;;  %v180_v16 = vsub.s32 6, %v155_v12 }
  0x5b   :  { %v160_v17 = vsub.s32 1, %v155_v12  ;;  %v168_v18 = vsub.s32 3, %v155_v12  ;;  %v176_v19 = vsub.s32 5, %v155_v12  ;;  %v184_v20 = vsub.s32 7, %v155_v12 }
  0x5c   :  { %v157_v21 = vrot.slane %v152_v4, %v156_v13  ;;  %v173_v22 = vrot.slane %v152_v4, %v172_v15 }
  0x5d   :  { %v185_v27 = vrot.slane %v152_v4, %v184_v20 }
  0x5e   :  { %1380 = vmatpush3.bf16.xpose.msk.msra.mxu0 %vm1542_vm1, %v1378_v23  ;;  %v181_v23 = vrot.slane %v152_v4, %v180_v16 }
  0x5f   :  { %1428 = vmatpush3.bf16.xpose.msk.msra.mxu1 %vm1542_vm1, %v1426_v24  ;;  %1383 = vmatprep.subr.msk.bf16.mxu0 %vm1542_vm1, %v1381_v25  ;;  %v161_v24 = vrot.slane %v152_v4, %v160_v17  ;;  %v169_v25 = vrot.slane %v152_v4, %v168_v18 }
  0x60   :  { %1431 = vmatprep.subr.msk.bf16.mxu1 %vm1542_vm1, %v1429_v26  ;;  %v177_v26 = vrot.slane %v152_v4, %v176_v19 }
  0x66   :  { %1386 = vmatpush3.bf16.xpose.msk.msra.mxu0 %vm1542_vm1, %v1384_v35 }
  0x67   :  { %1434 = vmatpush3.bf16.xpose.msk.msra.mxu1 %vm1542_vm1, %v1432_v36  ;;  %1389 = vmatprep.subr.msk.bf16.mxu0 %vm1542_vm1, %v1387_v37 }
  0x68   :  { %1437 = vmatprep.subr.msk.bf16.mxu1 %vm1542_vm1, %v1435_v38 }
  0x6e   :  { %1392 = vmatpush3.bf16.xpose.msk.msra.mxu0 %vm1542_vm1, %v1390_v48  ;;  %v1507_v48 = vmov -1e+30  }
  0x6f   :  { %1440 = vmatpush3.bf16.xpose.msk.msra.mxu1 %vm1542_vm1, %v1438_v49  ;;  %1395 = vmatprep.subr.msk.bf16.mxu0 %vm1542_vm1, %v1393_v50  ;;  %20 = vst.msk [vmem:[#allocation2] sm:$0xff] %vm19_vm2, %v1507_v48  ;;  %22 = vst.msk [vmem:[#allocation4] sm:$0xff] %vm19_vm2, %v1507_v48  ;;  %v1508_v49 = vmov 0.0   ;;  %v924_v50 = vand.u32 127, %v154_v11 }
  0x70   :  { %1443 = vmatprep.subr.msk.bf16.mxu1 %vm1542_vm1, %v1441_v51  ;;  %21 = vst.msk [vmem:[#allocation3] sm:$0xff] %vm19_vm2, %v1508_v49 }
  0x71   :  { %vm926_vm3 = vcmp.eq.s32.totalorder %v924_v50, 0 }
  0x76   :  { %1398 = vmatpush3.bf16.xpose.msk.msra.mxu0 %vm1542_vm1, %v1396_v60  ;;  %v908_v52 = vld [vmem:[#allocation2] sm:$0xff]  ;;  %v927_v56 = vld [vmem:[#allocation4] sm:$0xff] }
  0x77   :  { %1446 = vmatpush3.bf16.xpose.msk.msra.mxu1 %vm1542_vm1, %v1444_v61  ;;  %1401 = vmatprep.subr.msk.bf16.mxu0 %vm1542_vm1, %v1399_v62 }
  0x78   :  { %1449 = vmatprep.subr.msk.bf16.mxu1 %vm1542_vm1, %v1447_v63 }
  0x7e   :  { %1404 = vmatpush3.bf16.xpose.msk.msra.mxu0 %vm1542_vm1, %v1402_v5 }
  0x7f   :  { %1452 = vmatpush3.bf16.xpose.msk.msra.mxu1 %vm1542_vm1, %v1450_v6 }
  0x85   :  { %1226 = vmatmul.mubr.msk.f32.vlgmr.msra.gmra.mrb[2].mxu0 %vm194_vm0, %v1654_v45 }
  0x86   :  { %1260 = vmatmul.mubr.msk.f32.vlgmr.msra.gmra.mrb[2].mxu1 %vm194_vm0, %v1654_v45  ;;  %v165_v45 = vrot.slane %v152_v4, %v164_v14 }
 0x118   :  { %v648_v7 = vpop.f32.mrb[0].mxu0 }
 0x119   :  { %v719_v8 = vpop.f32.mrb[0].mxu1  ;;  %v650_v9 = vpop.f32.mrb[1].mxu0  ;;  %v649_v30 = vadd.f32 %v648_v7, %v157_v21 }
 0x11a   :  { %v721_v10 = vpop.f32.mrb[1].mxu1  ;;  %v720_v31 = vadd.f32 %v719_v8, %v165_v45  ;;  %v651_v36 = vadd.f32 %v650_v9, %v161_v24 }
 0x11b   :  { %v722_v37 = vadd.f32 %v721_v10, %v169_v25 }
 0x158   :  { %v790_v28 = vpop.f32.mrb[2].mxu0 }
 0x159   :  { %v861_v29 = vpop.f32.mrb[2].mxu1  ;;  %v791_v32 = vadd.f32 %v790_v28, %v173_v22  ;;  %v792_v34 = vpop.f32.mrb[3].mxu0  ;;  %v910_v28 = vld [vmem:[#allocation3] sm:$0xff] }
 0x15a   :  { %v862_v33 = vadd.f32 %v861_v29, %v181_v23  ;;  %v863_v35 = vpop.f32.mrb[3].mxu1  ;;  %v793_v38 = vadd.f32 %v792_v34, %v177_v26  ;;  %v1509_v23 = vmov 0  }
 0x15b   :  { %v864_v39 = vadd.f32 %v863_v35, %v185_v27  ;;  %v866_v40 = vmax.f32 %v649_v30, %v791_v32  ;;  %1457 = vset.pattern.permute.xlu1 %v1509_v23  ;;  %1458 = vset.pattern.permute.xlu0 %v1509_v23 }
 0x15c   :  { %v868_v41 = vmax.f32 %v720_v31, %v862_v33  ;;  %v867_v42 = vmax.f32 %v651_v36, %v793_v38 }
 0x15d   :  { %v869_v43 = vmax.f32 %v722_v37, %v864_v39 }
 0x15e   :  { %v870_v44 = vmax.f32 %v866_v40, %v867_v42 }
 0x15f   :  { %v871_v46 = vmax.f32 %v868_v41, %v869_v43 }
 0x161   :  { %v872_v47 = vmax.f32 %v870_v44, %v871_v46 }
 0x163   :  { %873 = vmax.xlane.f32.xlu0 %v872_v47 }
 0x1f0   :  { %v874_v51 = vpop.xlane.xlu0 %873 }
 0x1f1   :  { %v875_v53 = vsub.f32 %v649_v30, %v874_v51  ;;  %v876_v54 = vsub.f32 %v651_v36, %v874_v51  ;;  %v877_v55 = vsub.f32 %v720_v31, %v874_v51  ;;  %v878_v57 = vsub.f32 %v722_v37, %v874_v51 }
 0x1f2   :  { %v909_v60 = vmax.f32 %v908_v52, %v874_v51  ;;  %v879_v61 = vsub.f32 %v791_v32, %v874_v51  ;;  %v928_v63 = vsel %vm926_vm3, %v874_v51, %v927_v56  ;;  %v880_v1 = vsub.f32 %v793_v38, %v874_v51 }
 0x1f3   :  { %v883_v58 = vmul.f32 1.442695, %v875_v53  ;;  %v885_v59 = vmul.f32 1.442695, %v876_v54  ;;  %v887_v62 = vmul.f32 1.442695, %v877_v55  ;;  %v881_v3 = vsub.f32 %v862_v33, %v874_v51 }
 0x1f4   :  { %v911_v0 = vsub.f32 %v908_v52, %v909_v60  ;;  %922 = vst.msk [vmem:[#allocation2] sm:$0xff] %vm19_vm2, %v909_v60  ;;  %929 = vst.msk [vmem:[#allocation4] sm:$0xff] %vm19_vm2, %v928_v63  ;;  %v889_v2 = vmul.f32 1.442695, %v878_v57  ;;  %v891_v5 = vmul.f32 1.442695, %v879_v61  ;;  %v882_v6 = vsub.f32 %v864_v39, %v874_v51 }
 0x1f5   :  { %1459 = vpow2.f32 %v883_v58  ;;  %v893_v7 = vmul.f32 1.442695, %v880_v1  ;;  %v895_v8 = vmul.f32 1.442695, %v881_v3  ;;  %v915_v24 = vsub.f32 %v874_v51, %v909_v60 }
 0x1f6   :  { %1461 = vpow2.f32 %v885_v59  ;;  %v897_v9 = vmul.f32 1.442695, %v882_v6  ;;  %v912_v25 = vmul.f32 1.442695, %v911_v0 }
 0x1f7   :  { %1463 = vpow2.f32 %v887_v62  ;;  %v916_v26 = vmul.f32 1.442695, %v915_v24 }
 0x1f8   :  { %1465 = vpow2.f32 %v889_v2 }
 0x1f9   :  { %1467 = vpow2.f32 %v891_v5 }
 0x1fa   :  { %1469 = vpow2.f32 %v893_v7 }
 0x1fb   :  { %1471 = vpow2.f32 %v895_v8  ;;  %v944_v33 = vld [vmem:[#allocation4] sm:$0xff]  ;;  %v945_v34 = vld [vmem:[#allocation2] sm:$0xff] }
 0x1fc   :  { %1473 = vpow2.f32 %v897_v9  ;;  %v946_v36 = vsub.f32 %v944_v33, %v945_v34 }
 0x1fd   :  { %1475 = vpow2.f32 %v912_v25 }
 0x1fe   :  { %1477 = vpow2.f32 %v916_v26  ;;  %v947_v37 = vmul.f32 1.442695, %v946_v36 }
 0x1ff   :  { %v1460_v10 = vpop.eup %1459 }
 0x200   :  { %v1462_v11 = vpop.eup %1461  ;;  %1479 = vpow2.f32 %v947_v37 }
 0x201   :  { %v899_v12 = vadd.f32 %v1462_v11, %v1460_v10  ;;  %v1464_v13 = vpop.eup %1463 }
 0x202   :  { %v1466_v15 = vpop.eup %1465 }
 0x203   :  { %v900_v14 = vadd.f32 %v1464_v13, %v899_v12  ;;  %v1468_v4 = vpop.eup %1467 }
 0x204   :  { %v1470_v18 = vpop.eup %1469 }
 0x205   :  { %v901_v16 = vadd.f32 %v1466_v15, %v900_v14  ;;  %v1472_v20 = vpop.eup %1471 }
 0x206   :  { %v1474_v45 = vpop.eup %1473 }
 0x207   :  { %v902_v17 = vadd.f32 %v1468_v4, %v901_v16  ;;  %v1476_v27 = vpop.eup %1475 }
 0x208   :  { %v1478_v29 = vpop.eup %1477  ;;  %v914_v31 = vmul.f32 %v1476_v27, %v910_v28 }
 0x209   :  { %v903_v19 = vadd.f32 %v1470_v18, %v902_v17 }
 0x20a   :  { %v1480_v39 = vpop.eup %1479 }
 0x20b   :  { %v904_v21 = vadd.f32 %v1472_v20, %v903_v19 }
 0x20d   :  { %v905_v22 = vadd.f32 %v1474_v45, %v904_v21 }
 0x20f   :  { %906 = vadd.xlane.f32.xlu0 %v905_v22 }
 0x29c   :  { %v907_v30 = vpop.xlane.xlu0 %906 }
 0x29d   :  { %v918_v32 = vmul.f32 %v1478_v29, %v907_v30 }
 0x29f   :  { %v919_v35 = vadd.f32 %v918_v32, %v914_v31 }
 0x2a1   :  { %921 = vst.msk [vmem:[#allocation3] sm:$0xff] %vm19_vm2, %v919_v35 }
 0x2a8   :  { %v941_v38 = vld [vmem:[#allocation3] sm:$0xff] }
 0x2a9   :  { %1481 = vrcp.f32 %v941_v38 }
 0x2b3   :  { %v1482_v40 = vpop.eup %1481 }
 0x2b4   :  { %v949_v41 = vmul.f32 %v1482_v40, %v1480_v39 }
 0x2b6   :  { %960 = vperm.xlu1 %1457, %v949_v41  }
 0x335   :  { %v961_v42 = vpop.permute.xlu1 %960 }
 0x336   :  { %v963_v43 = vmul.f32 %v1460_v10, %v961_v42  ;;  %v964_v44 = vmul.f32 %v1462_v11, %v961_v42  ;;  %v965_v46 = vmul.f32 %v1464_v13, %v961_v42  ;;  %v966_v47 = vmul.f32 %v1466_v15, %v961_v42 }
 0x337   :  { %v967_v48 = vmul.f32 %v1468_v4, %v961_v42  ;;  %v968_v49 = vmul.f32 %v1470_v18, %v961_v42  ;;  %v969_v50 = vmul.f32 %v1472_v20, %v961_v42  ;;  %v970_v51 = vmul.f32 %v1474_v45, %v961_v42 }
 0x338   :  { %971 = vst [vmem:[#allocation5] sm:$0xff] %v963_v43  ;;  %972 = vst [vmem:[#allocation5 + $0x8] sm:$0xff] %v964_v44 }
 0x339   :  { %973 = vst [vmem:[#allocation5 + $0x10] sm:$0xff] %v965_v46  ;;  %974 = vst [vmem:[#allocation5 + $0x18] sm:$0xff] %v966_v47 }
 0x33a   :  { %975 = vst [vmem:[#allocation5 + $0x20] sm:$0xff] %v967_v48  ;;  %976 = vst [vmem:[#allocation5 + $0x28] sm:$0xff] %v968_v49 }
 0x33b   :  { %977 = vst [vmem:[#allocation5 + $0x30] sm:$0xff] %v969_v50  ;;  %978 = vst [vmem:[#allocation5 + $0x38] sm:$0xff] %v970_v51 }
 0x33c   :  { %1494 = shalt.err (!%p1491_p4)
}
 0x33d   :  { %s1495_s25 = scalar_lea.hbm %s2094_s3, 1024 }
 0x33e   :  { %p1496_p5 = scmp.ne.s32.totalorder %s2094_s3, %s1495_s25  ;;  %p1499_p6 = scmp.lt.u32.totalorder %s1495_s25, %s2094_s3 }
 0x340   :  { %p1501_p7 = pnand %p1499_p6, %p1496_p5 }
 0x342   :  { %1504 = shalt.err (!%p1501_p7)
}
 0x343   :  { %988 = dma.vmem_to_hbm [thread:$0]  %s986_s21, 1024, %s2094_s3, [#allocation6]  }
 0x344   :  { %1505 = dma.done.wait [#allocation6], 1024  }
 0x345   :  { %1506 = vsyncadd [#allocation6], 4294966272 }
 0x346   :  { %992 = vsyncpa [#allocation6], 1 }

</bundles_post_ra>
